<compile_context>
chip_gen: v7x
topology: tpu7x:2x2x1
jax: 0.10.0
libtpu: 0.0.40
codegen_flags: <defaults>
</compile_context>

<pallas_src>
import numpy as np

import jax
import jax.numpy as jnp
from jax.experimental import pallas as pl
from jax.experimental.pallas import tpu as pltpu

_BN_EPS = 1e-5
_VMEM_LIMIT_BYTES = 32 * 1024 * 1024     # >= v5e scoped default (16 MiB); safe on v6e/v7x
_STREAM_BUDGET_BYTES = 8 * 1024 * 1024   # double-buffered activation streams per grid step
_MAX_POINT_TILE = 8192


# --------------------------------------------------------------------------- planning

def _plan_layer(n_points, batch, bytes_per_lane, max_tile=_MAX_POINT_TILE):
    """Pick (tile, n_split, tiles_per_split) for one layer.

    tile: lanes per grid step -- largest multiple of 128 dividing N that keeps the
          double-buffered activation streams under _STREAM_BUDGET_BYTES (or N itself
          when N is small / has no 128-multiple divisor).
    n_split: point-axis split across the 'parallel' grid axis so both v7x
          TensorCores stay busy when the batch alone cannot fill them.
    """
    limit = max(128, _STREAM_BUDGET_BYTES // max(2 * bytes_per_lane, 1))
    limit = min(limit, max_tile)
    if n_points <= limit:
        tile = n_points
    else:
        tile = 0
        t = (min(limit, n_points) // 128) * 128
        while t >= 128:
            if n_points % t == 0:
                tile = t
                break
            t -= 128
        if tile == 0:
            # TODO(synk): pad the point axis instead of falling back to one full tile.
            tile = n_points
    n_tiles = n_points // tile
    n_split = 2 if (batch % 2 == 1 and n_tiles % 2 == 0) else 1
    return tile, n_split, n_tiles // n_split


def _point_block_map(n_split, tiles_per_split):
    if n_split == 1:
        return lambda i, t: (i, 0, t)

    def idx(i, t):
        return (i // n_split, 0, (i % n_split) * tiles_per_split + t)

    return idx


def _stat_block_map():
    return lambda i, t: (i, 0, 0)


def _const2d_map():
    return lambda i, t: (0, 0)


# --------------------------------------------------------------------------- kernels

def _layer0_conv_pallas(points, fv, w_pts, w_feat, *, tile, n_split,
                        tiles_per_split, act_dtype, emit_h):
    """Layer-0 1x1 conv over the (never materialized) grouped feature + BN stats.

    grouped = [points; points; feature_vector]  ->  conv(grouped) is computed as
    (w[:,0:3]+w[:,3:6]) @ points + w[:,6:] @ feature_vector (weight blocks pre-added
    by the wrapper).  Conv bias dropped (cancelled by the BN mean subtraction).
    emit_h=False (single-layer MLP): the conv output never leaves VMEM; only
    per-(batch,split) sum/sumsq/max/min are emitted.
    """
    B, _, N = points.shape
    c_out = w_pts.shape[0]
    have_fv = w_feat is not None
    cf = w_feat.shape[1] if have_fv else 0

    pt_map = _point_block_map(n_split, tiles_per_split)
    stat_map = _stat_block_map()
    cmap = _const2d_map()

    def kernel(*refs):
        it = iter(refs)
        p_ref = next(it)
        f_ref = next(it) if have_fv else None
        wp_ref = next(it)
        wf_ref = next(it) if have_fv else None
        h_ref = next(it) if emit_h else None
        s_ref = next(it)
        q_ref = next(it)
        mx_ref = None if emit_h else next(it)
        mn_ref = None if emit_h else next(it)

        t = pl.program_id(1)
        p = p_ref[0].astype(jnp.float32)                          # [3, tile]
        h = jnp.dot(wp_ref[...], p, preferred_element_type=jnp.float32)
        if have_fv:
            h = h + jnp.dot(wf_ref[...], f_ref[0].astype(jnp.float32),
                            preferred_element_type=jnp.float32)
        if emit_h:
            h_ref[0] = h.astype(act_dtype)                        # bf16/f32 stream
        # BN statistics always from the pre-cast f32 values.
        s = jnp.sum(h, axis=1, keepdims=True)                     # [c_out, 1]
        q = jnp.sum(h * h, axis=1, keepdims=True)
        if not emit_h:
            mx = jnp.max(h, axis=1, keepdims=True)
            mn = jnp.min(h, axis=1, keepdims=True)

        @pl.when(t == 0)
        def _init():
            s_ref[0] = s
            q_ref[0] = q
            if not emit_h:
                mx_ref[0] = mx
                mn_ref[0] = mn

        @pl.when(t != 0)
        def _acc():
            s_ref[0] = s_ref[0] + s
            q_ref[0] = q_ref[0] + q
            if not emit_h:
                mx_ref[0] = jnp.maximum(mx_ref[0], mx)
                mn_ref[0] = jnp.minimum(mn_ref[0], mn)

    args = [points]
    in_specs = [pl.BlockSpec((1, 3, tile), pt_map)]
    if have_fv:
        args.append(fv)
        in_specs.append(pl.BlockSpec((1, cf, tile), pt_map))
    args.append(w_pts)
    in_specs.append(pl.BlockSpec((c_out, 3), cmap))
    if have_fv:
        args.append(w_feat)
        in_specs.append(pl.BlockSpec((c_out, cf), cmap))

    stat_shape = jax.ShapeDtypeStruct((B * n_split, c_out, 1), jnp.float32)
    stat_spec = pl.BlockSpec((1, c_out, 1), stat_map)
    out_shape, out_specs = [], []
    if emit_h:
        out_shape.append(jax.ShapeDtypeStruct((B, c_out, N), act_dtype))
        out_specs.append(pl.BlockSpec((1, c_out, tile), pt_map))
    out_shape += [stat_shape, stat_shape]
    out_specs += [stat_spec, stat_spec]
    if not emit_h:
        out_shape += [stat_shape, stat_shape]
        out_specs += [stat_spec, stat_spec]

    c_in_total = 3 + cf
    act_bytes = np.dtype(act_dtype).itemsize
    cost = pl.CostEstimate(
        flops=2 * B * N * c_in_total * c_out,
        transcendentals=0,
        bytes_accessed=B * N * (4 * c_in_total
                                + (act_bytes * c_out if emit_h else 0)) + 4 * c_out * c_in_total,
    )
    return pl.pallas_call(
        kernel,
        out_shape=tuple(out_shape),
        grid_spec=pltpu.PrefetchScalarGridSpec(
            num_scalar_prefetch=0,
            grid=(B * n_split, tiles_per_split),
            in_specs=in_specs,
            out_specs=tuple(out_specs),
        ),
        compiler_params=pltpu.CompilerParams(
            dimension_semantics=("parallel", "arbitrary"),
            vmem_limit_bytes=_VMEM_LIMIT_BYTES),
        cost_estimate=cost,
    )(*args)


def _bn_relu_conv_pallas(h, scale, shift, w, *, tile, n_split, tiles_per_split,
                         act_dtype, emit_h):
    """Fused: BN(prev, pre-folded scale/shift) + ReLU + 1x1 conv (+ stats).

    emit_h=False (last MLP layer): the conv output is never written to HBM; only
    per-(batch,split) sum/sumsq/max/min are emitted and the wrapper finishes
    BN + ReLU + max-over-points analytically on a tiny [B, C, 1] tensor.
    """
    B, c_in, N = h.shape
    c_out = w.shape[0]

    pt_map = _point_block_map(n_split, tiles_per_split)
    stat_map = _stat_block_map()
    cmap = _const2d_map()

    def kernel(*refs):
        it = iter(refs)
        h_ref, sc_ref, sh_ref, w_ref = next(it), next(it), next(it), next(it)
        h_out_ref = next(it) if emit_h else None
        s_ref, q_ref = next(it), next(it)
        mx_ref = None if emit_h else next(it)
        mn_ref = None if emit_h else next(it)

        t = pl.program_id(1)
        x = h_ref[0].astype(jnp.float32)                          # [c_in, tile]
        y = jnp.maximum(x * sc_ref[...] + sh_ref[...], 0.0)       # folded BN + ReLU
        hn = jnp.dot(w_ref[...], y, preferred_element_type=jnp.float32)
        if emit_h:
            h_out_ref[0] = hn.astype(act_dtype)
        # Stats from the pre-cast f32 values (one-pass sum / sumsq; variance is
        # clamped at 0 in the wrapper).
        s = jnp.sum(hn, axis=1, keepdims=True)
        q = jnp.sum(hn * hn, axis=1, keepdims=True)
        if not emit_h:
            mx = jnp.max(hn, axis=1, keepdims=True)
            mn = jnp.min(hn, axis=1, keepdims=True)

        @pl.when(t == 0)
        def _init():
            s_ref[0] = s
            q_ref[0] = q
            if not emit_h:
                mx_ref[0] = mx
                mn_ref[0] = mn

        @pl.when(t != 0)
        def _acc():
            s_ref[0] = s_ref[0] + s
            q_ref[0] = q_ref[0] + q
            if not emit_h:
                mx_ref[0] = jnp.maximum(mx_ref[0], mx)
                mn_ref[0] = jnp.minimum(mn_ref[0], mn)

    in_specs = [
        pl.BlockSpec((1, c_in, tile), pt_map),
        pl.BlockSpec((c_in, 1), cmap),
        pl.BlockSpec((c_in, 1), cmap),
        pl.BlockSpec((c_out, c_in), cmap),
    ]
    stat_shape = jax.ShapeDtypeStruct((B * n_split, c_out, 1), jnp.float32)
    stat_spec = pl.BlockSpec((1, c_out, 1), stat_map)
    out_shape, out_specs = [], []
    if emit_h:
        out_shape.append(jax.ShapeDtypeStruct((B, c_out, N), act_dtype))
        out_specs.append(pl.BlockSpec((1, c_out, tile), pt_map))
    out_shape += [stat_shape, stat_shape]
    out_specs += [stat_spec, stat_spec]
    if not emit_h:
        out_shape += [stat_shape, stat_shape]
        out_specs += [stat_spec, stat_spec]

    in_bytes = h.dtype.itemsize
    act_bytes = np.dtype(act_dtype).itemsize
    cost = pl.CostEstimate(
        flops=2 * B * N * c_in * c_out,
        transcendentals=0,
        bytes_accessed=B * N * (in_bytes * c_in
                                + (act_bytes * c_out if emit_h else 0)) + 4 * c_out * c_in,
    )
    return pl.pallas_call(
        kernel,
        out_shape=tuple(out_shape),
        grid_spec=pltpu.PrefetchScalarGridSpec(
            num_scalar_prefetch=0,
            grid=(B * n_split, tiles_per_split),
            in_specs=in_specs,
            out_specs=tuple(out_specs),
        ),
        compiler_params=pltpu.CompilerParams(
            dimension_semantics=("parallel", "arbitrary"),
            vmem_limit_bytes=_VMEM_LIMIT_BYTES),
        cost_estimate=cost,
    )(h, scale, shift, w)


# ---------------------------------------------------------------------- host epilogue

def _fold_bn_scale_shift(ssum, ssq, gamma, beta, count, eps=_BN_EPS):
    """Training-mode BatchNorm folded to per-channel scale/shift ([C,1] each).

    One-pass variance E[x^2]-E[x]^2, clamped at 0.
    TODO(synk): use a shifted / two-pass variance if |mean| >> std ever matters.
    """
    s = jnp.sum(ssum, axis=0)                          # [C, 1]
    q = jnp.sum(ssq, axis=0)
    mean = s / count
    var = jnp.maximum(q / count - mean * mean, 0.0)
    scale = gamma.reshape(-1, 1) * jax.lax.rsqrt(var + eps)
    shift = beta.reshape(-1, 1) - mean * scale
    return scale, shift


# --------------------------------------------------------------------------- module

class PointNetSetAbstractionssg:
    """JAX/Pallas port of the PyTorch module (deterministic synthetic params).

    activation_dtype: dtype used to stream inter-layer activations through HBM.
        bfloat16 (default) halves the dominant HBM traffic; float32 reproduces the
        PyTorch forward to ~1e-3.  BN statistics are always accumulated in float32
        from the pre-cast values.
    """

    def __init__(self, n, radius, num_nearby_values, add_attribute, mlp, *, key,
                 activation_dtype=jnp.bfloat16, max_point_tile=_MAX_POINT_TILE):
        self.n = n
        self.radius = radius
        self.num_nearby_values = num_nearby_values
        self.add_attribute = add_attribute
        self.activation_dtype = activation_dtype
        self.max_point_tile = max_point_tile
        self.params = []
        in_channel = add_attribute + 3
        for i, out_channel in enumerate(mlp):
            if i == 0:
                in_channel = add_attribute + 3
            key, kw, kb = jax.random.split(key, 3)
            bound = 1.0 / float(in_channel) ** 0.5
            w = jax.random.uniform(kw, (out_channel, in_channel), jnp.float32,
                                   minval=-bound, maxval=bound)
            # Conv bias kept for parity with nn.Conv2d but NOT applied in the kernels:
            # a per-channel constant is exactly cancelled by the training-mode BN mean
            # subtraction, so dropping it is a free, exact optimization.
            b = jax.random.uniform(kb, (out_channel,), jnp.float32,
                                   minval=-bound, maxval=bound)
            gamma = jnp.ones((out_channel,), jnp.float32)   # BN default init
            beta = jnp.zeros((out_channel,), jnp.float32)
            self.params.append((w, b, gamma, beta))
            in_channel = out_channel

    def __call__(self, points, feature_vector):
        B, _, N = points.shape
        n_layers = len(self.params)
        act_dtype = self.activation_dtype
        act_bytes = np.dtype(act_dtype).itemsize
        count = float(B * N)

        pts = points.astype(jnp.float32)
        cf = max(self.add_attribute - 3, 0)
        fv = feature_vector.astype(jnp.float32) if self.add_attribute > 3 else None
        # (add_attribute == 3: grouped feature is just [points; points]; other small
        #  values would hit the same channel mismatch as the PyTorch module.)

        # -- Layer 0: grouped-feature conv (+ stats; + max/min if it is the last) ----
        w0 = self.params[0][0]
        w_pts = w0[:, 0:3] + w0[:, 3:6]                  # grouped = [points; points; fv]
        w_feat = w0[:, 6:] if fv is not None else None
        c_out0 = w0.shape[0]
        emit_h = n_layers > 1
        per_lane = 4 * (3 + (cf if fv is not None else 0)) + (act_bytes * c_out0 if emit_h else 0)
        tile, n_split, tps = _plan_layer(N, B, per_lane, self.max_point_tile)
        res = _layer0_conv_pallas(pts, fv, w_pts, w_feat, tile=tile, n_split=n_split,
                                  tiles_per_split=tps, act_dtype=act_dtype,
                                  emit_h=emit_h)
        if emit_h:
            h, ssum, ssq = res
        else:
            ssum, ssq, hmax, hmin = res

        # -- Layers 1..L-1: fused BN(prev) + ReLU + conv; last layer also reduces ----
        for i in range(1, n_layers):
            g_prev, b_prev = self.params[i - 1][2], self.params[i - 1][3]
            scale, shift = _fold_bn_scale_shift(ssum, ssq, g_prev, b_prev, count)
            w = self.params[i][0]
            c_in, c_out = w.shape[1], w.shape[0]
            emit_h = i < n_layers - 1
            per_lane = h.dtype.itemsize * c_in + (act_bytes * c_out if emit_h else 0)
            tile, n_split, tps = _plan_layer(N, B, per_lane, self.max_point_tile)
            res = _bn_relu_conv_pallas(h, scale, shift, w, tile=tile, n_split=n_split,
                                       tiles_per_split=tps, act_dtype=act_dtype,
                                       emit_h=emit_h)
            if emit_h:
                h, ssum, ssq = res
            else:
                ssum, ssq, hmax, hmin = res

        # -- Epilogue: last BN + ReLU + max over points, on tiny [B, C, 1] tensors ---
        g_last, b_last = self.params[-1][2], self.params[-1][3]
        scale, shift = _fold_bn_scale_shift(ssum, ssq, g_last, b_last, count)
        c_last = self.params[-1][0].shape[0]
        hmax = jnp.max(hmax.reshape(B, -1, c_last, 1), axis=1)   # reduce split axis
        hmin = jnp.min(hmin.reshape(B, -1, c_last, 1), axis=1)
        # max_n relu(scale*h_n + shift) == relu(max(scale*hmax+shift, scale*hmin+shift))
        total_feature = jnp.maximum(
            jnp.maximum(scale * hmax + shift, scale * hmin + shift), 0.0)

        new_points = jnp.transpose(points, (0, 2, 1))            # [B, N, 3]
        return new_points, total_feature


# ----------------------------------------------------------------------- verification

def _reference_forward(module, points, feature_vector, eps=_BN_EPS):
    """Pure-JAX, f32, with-bias re-implementation of the PyTorch forward."""
    if module.add_attribute == 0:
        feat = points
    else:
        feat = jnp.concatenate((points, feature_vector), axis=-2)
    x = jnp.concatenate((points, feat), axis=-2).astype(jnp.float32)     # [B, C0, N]
    for (w, b, g, be) in module.params:
        h = jnp.einsum('oc,bcn->bon', w, x,
                       precision=jax.lax.Precision.HIGHEST) + b[None, :, None]
        mean = jnp.mean(h, axis=(0, 2), keepdims=True)
        var = jnp.mean(jnp.square(h - mean), axis=(0, 2), keepdims=True)
        x = jnp.maximum((h - mean) / jnp.sqrt(var + eps) * g[None, :, None]
                        + be[None, :, None], 0.0)
    total = jnp.max(x, axis=2)[..., None]                                # [B, C_last, 1]
    new_points = jnp.transpose(points, (0, 2, 1))
    return new_points, total


def _check(module, points, feature_vector, *, atol, rtol, label):
    new_points, total = module(points, feature_vector)
    jax.block_until_ready((new_points, total))
    ref_points, ref_total = _reference_forward(module, points, feature_vector)
    assert new_points.shape == ref_points.shape, (label, new_points.shape)
    assert total.shape == ref_total.shape, (label, total.shape)
    assert total.dtype == jnp.float32, (label, total.dtype)
    assert bool(jnp.allclose(new_points, ref_points, atol=1e-6)), \
        f"{label}: new_points mismatch"
    max_err = float(jnp.max(jnp.abs(total - ref_total)))
    assert bool(jnp.allclose(total, ref_total, atol=atol, rtol=rtol)), \
        f"{label}: total_feature mismatch (max abs err {max_err:.3e})"


if __name__ == "__main__":
    key = jax.random.PRNGKey(0)
    k_pts, k_feat, k_params, k_pts2, k_feat2 = jax.random.split(key, 5)

    # ---- Config 1: exercises layer-0, middle and fused-last kernel variants --------
    B, N, add_attribute, mlp = 2, 16, 6, [16, 32, 32]
    points = jax.random.normal(k_pts, (B, 3, N), jnp.float32)
    fv = jax.random.normal(k_feat, (B, add_attribute - 3, N), jnp.float32)

    mod_f32 = PointNetSetAbstractionssg(1, 0.2, 8, add_attribute, mlp, key=k_params,
                                        activation_dtype=jnp.float32)
    _check(mod_f32, points, fv, atol=2e-3, rtol=2e-3, label="f32 activations")

    # bf16 inter-layer streaming (default): ~2x less HBM traffic, <=~1% output error.
    mod_bf16 = PointNetSetAbstractionssg(1, 0.2, 8, add_attribute, mlp, key=k_params,
                                         activation_dtype=jnp.bfloat16)
    _check(mod_bf16, points, fv, atol=5e-2, rtol=5e-2, label="bf16 activations")

    # ---- Config 2: multi-tile point axis + megacore point-split (B == 1) -----------
    B2, N2, mlp2 = 1, 512, [8, 16]
    points2 = jax.random.normal(k_pts2, (B2, 3, N2), jnp.float32)
    fv2 = jax.random.normal(k_feat2, (B2, add_attribute - 3, N2), jnp.float32)
    mod_tiled = PointNetSetAbstractionssg(1, 0.2, 8, add_attribute, mlp2, key=k_params,
                                          activation_dtype=jnp.float32,
                                          max_point_tile=128)
    _check(mod_tiled, points2, fv2, atol=2e-3, rtol=2e-3, label="tiled + split")

    # ---- Config 3: single-layer MLP (layer 0 is also the fused, reduced last) ------
    mod_single = PointNetSetAbstractionssg(1, 0.2, 8, add_attribute, [8], key=k_params,
                                           activation_dtype=jnp.float32)
    _check(mod_single, points, fv, atol=2e-3, rtol=2e-3, label="single layer")

    print("KERNEL_OK")
</pallas_src>

<mosaic_0001>
module attributes {stable_mosaic.version = 11 : i64} {
  func.func @kernel(%arg0: i32, %arg1: i32, %arg2: memref<1x3x16xf32, #tpu.memory_space<vmem>>, %arg3: memref<1x3x16xf32, #tpu.memory_space<vmem>>, %arg4: memref<16x3xf32, #tpu.memory_space<vmem>>, %arg5: memref<16x3xf32, #tpu.memory_space<vmem>>, %arg6: memref<1x16x16xf32, #tpu.memory_space<vmem>>, %arg7: memref<1x16x1xf32, #tpu.memory_space<vmem>>, %arg8: memref<1x16x1xf32, #tpu.memory_space<vmem>>) attributes {dimension_semantics = [#tpu.dimension_semantics<parallel>, #tpu.dimension_semantics<arbitrary>], iteration_bounds = array<i64: 2, 1>, scalar_prefetch = 0 : i64, scratch_operands = 0 : i64, tpu.core_type = #tpu.core_type<tc>, window_params = [{transform_indices = @transform_0, window_bounds = array<i64: 1, 3, 16>}, {transform_indices = @transform_1, window_bounds = array<i64: 1, 3, 16>}, {pipeline_mode = #tpu.pipeline_mode<synchronous>, transform_indices = @transform_2, window_bounds = array<i64: 16, 3>}, {pipeline_mode = #tpu.pipeline_mode<synchronous>, transform_indices = @transform_3, window_bounds = array<i64: 16, 3>}, {transform_indices = @transform_4, window_bounds = array<i64: 1, 16, 16>}, {transform_indices = @transform_5, window_bounds = array<i64: 1, 16, 1>}, {transform_indices = @transform_6, window_bounds = array<i64: 1, 16, 1>}]} {
    %c0 = arith.constant 0 : index
    %c0_0 = arith.constant 0 : index
    %c0_1 = arith.constant 0 : index
    %0 = vector.load %arg2[%c0, %c0_0, %c0_1] : memref<1x3x16xf32, #tpu.memory_space<vmem>>, vector<1x3x16xf32>
    %1 = vector.shape_cast %0 : vector<1x3x16xf32> to vector<3x16xf32>
    %c0_2 = arith.constant 0 : index
    %c0_3 = arith.constant 0 : index
    %2 = vector.load %arg4[%c0_2, %c0_3] : memref<16x3xf32, #tpu.memory_space<vmem>>, vector<16x3xf32>
    %cst = arith.constant dense<0.000000e+00> : vector<16x16xf32>
    %3 = tpu.matmul %2, %1, %cst {dimension_numbers = #tpu.dot_dimension_numbers<[1], [0], [0], [1], [0, 0, 1, 1], [], []>} : vector<16x3xf32>, vector<3x16xf32>, vector<16x16xf32> -> vector<16x16xf32>
    %c0_4 = arith.constant 0 : index
    %c0_5 = arith.constant 0 : index
    %4 = vector.load %arg5[%c0_4, %c0_5] : memref<16x3xf32, #tpu.memory_space<vmem>>, vector<16x3xf32>
    %c0_6 = arith.constant 0 : index
    %c0_7 = arith.constant 0 : index
    %c0_8 = arith.constant 0 : index
    %5 = vector.load %arg3[%c0_6, %c0_7, %c0_8] : memref<1x3x16xf32, #tpu.memory_space<vmem>>, vector<1x3x16xf32>
    %6 = vector.shape_cast %5 : vector<1x3x16xf32> to vector<3x16xf32>
    %cst_9 = arith.constant dense<0.000000e+00> : vector<16x16xf32>
    %7 = tpu.matmul %4, %6, %cst_9 {dimension_numbers = #tpu.dot_dimension_numbers<[1], [0], [0], [1], [0, 0, 1, 1], [], []>} : vector<16x3xf32>, vector<3x16xf32>, vector<16x16xf32> -> vector<16x16xf32>
    %8 = arith.addf %3, %7 : vector<16x16xf32>
    %c0_10 = arith.constant 0 : index
    %c0_11 = arith.constant 0 : index
    %c0_12 = arith.constant 0 : index
    %9 = vector.load %arg6[%c0_10, %c0_11, %c0_12] : memref<1x16x16xf32, #tpu.memory_space<vmem>>, vector<1x16x16xf32>
    %10 = vector.shape_cast %9 : vector<1x16x16xf32> to vector<16x16xf32>
    %11 = vector.shape_cast %8 : vector<16x16xf32> to vector<1x16x16xf32>
    tpu.vector_store %arg6[%c0_10, %c0_11, %c0_12], %11 {strides = array<i32>} : memref<1x16x16xf32, #tpu.memory_space<vmem>>, vector<1x16x16xf32>,
    %cst_13 = arith.constant dense<0.000000e+00> : vector<16xf32>
    %12 = vector.multi_reduction <add>, %8, %cst_13 [1] : vector<16x16xf32> to vector<16xf32>
    %13 = vector.shape_cast %12 : vector<16xf32> to vector<16x1xf32>
    %14 = arith.mulf %8, %8 : vector<16x16xf32>
    %cst_14 = arith.constant dense<0.000000e+00> : vector<16xf32>
    %15 = vector.multi_reduction <add>, %14, %cst_14 [1] : vector<16x16xf32> to vector<16xf32>
    %16 = vector.shape_cast %15 : vector<16xf32> to vector<16x1xf32>
    %c0_i32 = arith.constant 0 : i32
    %17 = arith.cmpi eq, %arg1, %c0_i32 : i32
    %18 = arith.extui %17 : i1 to i32
    %c0_i32_15 = arith.constant 0 : i32
    %19 = arith.cmpi ne, %18, %c0_i32_15 : i32
    scf.if %19 {
      %c0_18 = arith.constant 0 : index
      %c0_19 = arith.constant 0 : index
      %c0_20 = arith.constant 0 : index
      %23 = vector.load %arg7[%c0_18, %c0_19, %c0_20] : memref<1x16x1xf32, #tpu.memory_space<vmem>>, vector<1x16x1xf32>
      %24 = vector.shape_cast %23 : vector<1x16x1xf32> to vector<16x1xf32>
      %25 = vector.shape_cast %13 : vector<16x1xf32> to vector<1x16x1xf32>
      tpu.vector_store %arg7[%c0_18, %c0_19, %c0_20], %25 {strides = array<i32>} : memref<1x16x1xf32, #tpu.memory_space<vmem>>, vector<1x16x1xf32>,
      %c0_21 = arith.constant 0 : index
      %c0_22 = arith.constant 0 : index
      %c0_23 = arith.constant 0 : index
      %26 = vector.load %arg8[%c0_21, %c0_22, %c0_23] : memref<1x16x1xf32, #tpu.memory_space<vmem>>, vector<1x16x1xf32>
      %27 = vector.shape_cast %26 : vector<1x16x1xf32> to vector<16x1xf32>
      %28 = vector.shape_cast %16 : vector<16x1xf32> to vector<1x16x1xf32>
      tpu.vector_store %arg8[%c0_21, %c0_22, %c0_23], %28 {strides = array<i32>} : memref<1x16x1xf32, #tpu.memory_space<vmem>>, vector<1x16x1xf32>,
    } else {
    }
    %c0_i32_16 = arith.constant 0 : i32
    %20 = arith.cmpi ne, %arg1, %c0_i32_16 : i32
    %21 = arith.extui %20 : i1 to i32
    %c0_i32_17 = arith.constant 0 : i32
    %22 = arith.cmpi ne, %21, %c0_i32_17 : i32
    scf.if %22 {
      %c0_18 = arith.constant 0 : index
      %c0_19 = arith.constant 0 : index
      %c0_20 = arith.constant 0 : index
      %23 = vector.load %arg7[%c0_18, %c0_19, %c0_20] : memref<1x16x1xf32, #tpu.memory_space<vmem>>, vector<1x16x1xf32>
      %24 = vector.shape_cast %23 : vector<1x16x1xf32> to vector<16x1xf32>
      %25 = arith.addf %24, %13 : vector<16x1xf32>
      %c0_21 = arith.constant 0 : index
      %c0_22 = arith.constant 0 : index
      %c0_23 = arith.constant 0 : index
      %26 = vector.load %arg7[%c0_21, %c0_22, %c0_23] : memref<1x16x1xf32, #tpu.memory_space<vmem>>, vector<1x16x1xf32>
      %27 = vector.shape_cast %26 : vector<1x16x1xf32> to vector<16x1xf32>
      %28 = vector.shape_cast %25 : vector<16x1xf32> to vector<1x16x1xf32>
      tpu.vector_store %arg7[%c0_21, %c0_22, %c0_23], %28 {strides = array<i32>} : memref<1x16x1xf32, #tpu.memory_space<vmem>>, vector<1x16x1xf32>,
      %c0_24 = arith.constant 0 : index
      %c0_25 = arith.constant 0 : index
      %c0_26 = arith.constant 0 : index
      %29 = vector.load %arg8[%c0_24, %c0_25, %c0_26] : memref<1x16x1xf32, #tpu.memory_space<vmem>>, vector<1x16x1xf32>
      %30 = vector.shape_cast %29 : vector<1x16x1xf32> to vector<16x1xf32>
      %31 = arith.addf %30, %16 : vector<16x1xf32>
      %c0_27 = arith.constant 0 : index
      %c0_28 = arith.constant 0 : index
      %c0_29 = arith.constant 0 : index
      %32 = vector.load %arg8[%c0_27, %c0_28, %c0_29] : memref<1x16x1xf32, #tpu.memory_space<vmem>>, vector<1x16x1xf32>
      %33 = vector.shape_cast %32 : vector<1x16x1xf32> to vector<16x1xf32>
      %34 = vector.shape_cast %31 : vector<16x1xf32> to vector<1x16x1xf32>
      tpu.vector_store %arg8[%c0_27, %c0_28, %c0_29], %34 {strides = array<i32>} : memref<1x16x1xf32, #tpu.memory_space<vmem>>, vector<1x16x1xf32>,
    } else {
    }
    return
  }
  func.func @transform_0(%arg0: i32, %arg1: i32) -> (i32, i32, i32) {
    %c0_i32 = arith.constant 0 : i32
    %c0_i32_0 = arith.constant 0 : i32
    return %arg0, %c0_i32, %arg1 : i32, i32, i32
  }
  func.func @transform_1(%arg0: i32, %arg1: i32) -> (i32, i32, i32) {
    %c0_i32 = arith.constant 0 : i32
    %c0_i32_0 = arith.constant 0 : i32
    return %arg0, %c0_i32, %arg1 : i32, i32, i32
  }
  func.func @transform_2(%arg0: i32, %arg1: i32) -> (i32, i32) {
    %c0_i32 = arith.constant 0 : i32
    %c0_i32_0 = arith.constant 0 : i32
    %c0_i32_1 = arith.constant 0 : i32
    return %c0_i32, %c0_i32_0 : i32, i32
  }
  func.func @transform_3(%arg0: i32, %arg1: i32) -> (i32, i32) {
    %c0_i32 = arith.constant 0 : i32
    %c0_i32_0 = arith.constant 0 : i32
    %c0_i32_1 = arith.constant 0 : i32
    return %c0_i32, %c0_i32_0 : i32, i32
  }
  func.func @transform_4(%arg0: i32, %arg1: i32) -> (i32, i32, i32) {
    %c0_i32 = arith.constant 0 : i32
    %c0_i32_0 = arith.constant 0 : i32
    return %arg0, %c0_i32, %arg1 : i32, i32, i32
  }
  func.func @transform_5(%arg0: i32, %arg1: i32) -> (i32, i32, i32) {
    %c0_i32 = arith.constant 0 : i32
    %c0_i32_0 = arith.constant 0 : i32
    %c0_i32_1 = arith.constant 0 : i32
    return %arg0, %c0_i32, %c0_i32_0 : i32, i32, i32
  }
  func.func @transform_6(%arg0: i32, %arg1: i32) -> (i32, i32, i32) {
    %c0_i32 = arith.constant 0 : i32
    %c0_i32_0 = arith.constant 0 : i32
    %c0_i32_1 = arith.constant 0 : i32
    return %arg0, %c0_i32, %c0_i32_0 : i32, i32, i32
  }
}

</mosaic_0001>

<bundles_post_ra>
// kernel: tpu_custom_call.1
= control target key start
LH: loop header
LB: loop body
LE: loop exit
PB: predicated region body
PF: predicated region fallthrough
CT: control target
= control target key end

     0   :  { %12 = vsyncpa [#allocation3], 0  ;;  %s1084_s0 = inlined_call_operand.vmem [shape: f32[2,3,16], index: 0, kind: input, shape index: {}]   ;;  %s1085_s1 = inlined_call_operand.vmem [shape: f32[2,3,16], index: 1, kind: input, shape index: {}]   ;;  %s1086_s2 = inlined_call_operand.vmem [shape: f32[16,3], index: 2, kind: input, shape index: {}]   ;;  %s1087_s3 = inlined_call_operand.vmem [shape: f32[16,3], index: 3, kind: input, shape index: {}]   ;;  %s1088_s4 = inlined_call_operand.hbm [shape: f32[2,16,16], index: 4, kind: output, shape index: {0}]   ;;  %s1089_s5 = inlined_call_operand.vmem [shape: f32[2,16,1], index: 5, kind: output, shape index: {1}]   ;;  %s1090_s6 = inlined_call_operand.vmem [shape: f32[2,16,1], index: 6, kind: output, shape index: {2}]  }
   0x1   :  { %14 = vsyncpa [#allocation3 + $0x1], 0  ;;  %s934_s21 = smov 0   ;;  %s936_s22 = smov 0  }
   0x2   :  { %s938_s23 = smov 0   ;;  %s940_s24 = smov 0  }
   0x3   :  { %s942_s25 = smov 0   ;;  %s944_s26 = smov 0  }
   0x4 LB: > { %s715_s27 = sadd.s32 4294967295, %s894_s26   ;;  %s716_s28 = sadd.s32 4294967294, %s894_s26   ;;  %s894_s26 = sphi %s944_s26, %s20_s26   ;;  %s890_s25 = sphi %s942_s25, %s1097_s25   ;;  %s886_s24 = sphi %s940_s24, %s1096_s24   ;;  %s882_s23 = sphi %s938_s23, %s1095_s23   ;;  %s878_s22 = sphi %s936_s22, %s1094_s22   ;;  %s874_s21 = sphi %s934_s21, %s1093_s21  }
   0x5   : > { %s32_s29 = sadd.s32 1, %s890_s25  ;;  %s139_s30 = sadd.s32 1, %s882_s23 }
   0x6   : > { %p34_p0 = scmp.ge.s32.totalorder %s32_s29, 2  ;;  %p149_p1 = scmp.ne.s32.totalorder %s882_s23, %s878_s22 }
   0x7   : > { %p150_p2 = scmp.eq.s32.totalorder %s715_s27, 1  ;;  %p155_p3 = scmp.ne.s32.totalorder %s878_s22, %s874_s21 }
   0x8   : > { %s1099_s29 = smov (%p34_p0, %s32_s29), 0  ;;  %p156_p5 = scmp.eq.s32.totalorder %s716_s28, 1 }
   0x9   : > { %p974_p4 = por %p150_p2, %p149_p1  ;;  %s134_s8 = ssub.s32 %s890_s25, %s1099_s29 }
   0xa   : > { %p719_p6 = scmp.ge.s32.totalorder %s894_s26, 1  ;;  %p137_p7 = scmp.eq.s32.totalorder %s134_s8, 0 }
   0xb   : > { %p981_p8 = por %p156_p5, %p155_p3  ;;  %p252_p9 = scmp.lt.s32.totalorder %s894_s26, 3 }
   0xc   : > { %s987_s10 = scalar_select %p137_p7, %s882_s23, %s139_s30  }
   0xd   : > { %p253_p10 = pnand %p719_p6, %p252_p9 }
   0xe   : > { %p301_p11 = scmp.lt.s32.totalorder (!%p253_p10), %s886_s24, 1  ;;  %v328_v0 = vld [vmem:[%s1087_s3] sm:$0xff] (!%p253_p10)  ;;  %vm331_vm0 = vcmask (!%p253_p10), 23552   ;;  %vm338_vm1 = vcmask (!%p253_p10), 1042432   ;;  %v329_v2 = vld [vmem:[%s1087_s3 + $0x8] sm:$0xff] (!%p253_p10)  ;;  %s284_s13 = sand.u32 (!%p253_p10), 1, %s878_s22  }
   0xf   : > { %256 = sbr.rel (%p253_p10) target bundleno = 395 (0x18b), region = 36  ;;  %v326_v1 = vld [vmem:[%s1086_s2] sm:$0xff] (!%p253_p10)  ;;  %749 = vmatprep.mubr.msk.f32.mxu1 (!%p253_p10), %vm331_vm0, %v328_v0  ;;  %v327_v5 = vld [vmem:[%s1086_s2 + $0x8] sm:$0xff] (!%p253_p10)  ;;  %s720_s14 = sshll.u32 (!%p253_p10), %s284_s13, 4  ;;  %vm501_vm2 = vcmask (!%p253_p10), 130048  }
  0x10   : > { %754 = vmatprep.mubr.msk.f32.mxu0 (!%p253_p10), %vm331_vm0, %v326_v1  ;;  %s740_s18 = sshll.u32 (!%p253_p10), %s886_s24, 8  ;;  %s896_s8 = smov (!%p253_p10), [#allocation2]  }
  0x11   : > { %s1029_s27 = scalar_lea.hbm (!%p253_p10), %s1088_s4, %s740_s18  ;;  %s820_s11 = sshll.u32 (!%p253_p10), %s896_s8, 4  ;;  %s821_s11 = int_to_ptr.vmem [resolvable:$false] %s820_s11 }
  0x12   : > { %s822_s12 = scalar_lea.vmem (!%p253_p10), %s821_s11, 512 }
  0x16   : > { %s999_s15 = scalar_select %p301_p11, %s886_s24, 1 }
  0x18   : > { %s721_s16 = sshll.u32 %s999_s15, 2 }
  0x19   : > { %s314_s19 = scalar_lea.vmem %s1085_s1, %s721_s16  ;;  %s307_s28 = scalar_lea.vmem %s1084_s0, %s721_s16 }
  0x1a   : > { %v330_v3 = vld [vmem:[%s314_s19] sm:$0x7]  ;;  %s286_s16 = scalar_lea.vmem [#allocation2], %s720_s14 }
  0x1b   : > { %v325_v4 = vld [vmem:[%s307_s28] sm:$0x7]  ;;  %747 = vmatprep.subr.msk.mxu1 %vm338_vm1, %v330_v3  ;;  %s569_s17 = sshll.u32 %s286_s16, 4  ;;  %s1031_s28 = scalar_lea.sflag [#allocation3], %s284_s13  ;;  %s1023_s17 = int_to_ptr.vmem [resolvable:$true] %s569_s17 }
  0x1c   : > { %752 = vmatprep.subr.msk.mxu0 %vm338_vm1, %v325_v4  ;;  %748 = vmatpush3.msk.msra.mxu1 %vm338_vm1, %v330_v3  ;;  %s816_s30 = scalar_lea.vmem %s1023_s17, 256  ;;  %p823_p1 = scmp.lt.s32.totalorder %s1023_s17, %s821_s11 }
  0x1d   : > { %753 = vmatpush3.msk.msra.mxu0 %vm338_vm1, %v325_v4  ;;  %750 = vmatmul.mubr.msk.f32.vlgmr.msra.gmra.mrb[0].mxu1 %vm331_vm0, %v329_v2  ;;  %p817_p12 = scmp.ne.s32.totalorder %s1023_s17, %s816_s30  ;;  %p824_p2 = scmp.lt.s32.totalorder %s822_s12, %s816_s30 }
  0x1e   : > { %755 = vmatmul.mubr.msk.f32.vlgmr.msra.gmra.mrb[0].mxu0 %vm331_vm0, %v327_v5 }
  0x1f   : > { %p818_p13 = pnand %p817_p12, %p974_p4  ;;  %p825_p3 = por %p824_p2, %p823_p1 }
  0x21   : > { %p819_p0 = pneg %p818_p13 }
  0x23   : > { %p826_p5 = pnand %p825_p3, %p819_p0 }
  0xf0   : > { %v751_v6 = vpop.f32.mrb[0].mxu1 }
  0xf1   : > { %v756_v7 = vpop.f32.mrb[0].mxu0  ;;  %v408_v9 = vpop.f32.mrb[1].mxu1 }
  0xf2   : > { %v498_v8 = vadd.f32 %v756_v7, %v751_v6  ;;  %v492_v10 = vpop.f32.mrb[1].mxu0 }
  0xf3   : > { %v493_v11 = vadd.f32 %v492_v10, %v408_v9 }
  0xf4   : > { %503 = vst.msk [vmem:[%s286_s16 + $0x8] sm:$0xff] %vm501_vm2, %v498_v8  ;;  %v511_v15 = vmul.f32 %v498_v8, %v498_v8  ;;  %v507_v16 = vsel %vm501_vm2, %v498_v8, 0.0 }
  0xf5   : > { %502 = vst.msk [vmem:[%s286_s16] sm:$0xff] %vm501_vm2, %v493_v11  ;;  %v504_v12 = vsel %vm501_vm2, %v493_v11, 0.0  ;;  %v510_v13 = vmul.f32 %v493_v11, %v493_v11 }
  0xf6   : > { %505 = vadd.xlane.f32.xlu0 %v504_v12  ;;  %v515_v17 = vsel %vm501_vm2, %v511_v15, 0.0 }
  0xf7   : > { %v512_v14 = vsel %vm501_vm2, %v510_v13, 0.0 }
  0xf8   : > { %513 = vadd.xlane.f32.xlu1 %v512_v14 }
  0xfa   : > { %508 = vadd.xlane.f32.xlu0 %v507_v16 }
  0xfc   : > { %516 = vadd.xlane.f32.xlu1 %v515_v17 }
  0xfd   : > { %829 = shalt.err (!%p826_p5)
}
  0xfe   : > { %s830_s24 = scalar_lea.hbm %s1029_s27, 256  ;;  %s834_s16 = scalar_lea.hbm %s1088_s4, 512 }
  0xff   : > { %p831_p6 = scmp.ne.s32.totalorder %s1029_s27, %s830_s24  ;;  %p835_p10 = scmp.lt.u32.totalorder %s1029_s27, %s1088_s4 }
 0x100   : > { %p836_p11 = scmp.lt.u32.totalorder %s834_s16, %s830_s24  ;;  %p838_p13 = scmp.lt.u32.totalorder %s830_s24, %s1029_s27 }
 0x101   : > { %p832_p7 = pnand %p831_p6, %p974_p4 }
 0x102   : > { %p837_p12 = por %p836_p11, %p835_p10 }
 0x103   : > { %p833_p9 = pneg %p832_p7 }
 0x104   : > { %p839_p0 = por %p838_p13, %p837_p12 }
 0x106   : > { %p840_p1 = pnand %p839_p0, %p833_p9 }
 0x108   : > { %843 = shalt.err (!%p840_p1)
}
 0x109   : > { %s897_s20 = smov 128   ;;  %s898_s30 = smov 8   ;;  %vm522_vm3 = vcmask 7168  }
 0x10a   : > { %759 = dma.vmem_to_hbm [thread:$0]  (%p974_p4), %s1023_s17, 256, %s1029_s27, %s1031_s28, %s897_s20, %s897_s20, %s898_s30  }
 0x10b   : > { %s738_s8 = sshll.u32 %s999_s15, 4 }
 0x10c   : > { %s319_s13 = scalar_lea.vmem %s1089_s5, %s738_s8  ;;  %s324_s16 = scalar_lea.vmem %s1090_s6, %s738_s8 }
 0x183   : > { %v506_v18 = vpop.xlane.xlu0 %505 }
 0x184   : > { %523 = vst.msk [vmem:[%s319_s13] sm:$0xff] %vm522_vm3, %v506_v18 }
 0x185   : > { %v514_v19 = vpop.xlane.xlu1 %513 }
 0x186   : > { %525 = vst.msk [vmem:[%s324_s16] sm:$0xff] %vm522_vm3, %v514_v19 }
 0x187   : > { %v509_v20 = vpop.xlane.xlu0 %508 }
 0x188   : > { %524 = vst.msk [vmem:[%s319_s13 + $0x8] sm:$0xff] %vm522_vm3, %v509_v20 }
 0x189   : > { %v517_v21 = vpop.xlane.xlu1 %516 }
 0x18a   : > { %526 = vst.msk [vmem:[%s324_s16 + $0x8] sm:$0xff] %vm522_vm3, %v517_v21 }
 0x18b PF: > { %p765_p4 = scmp.ge.s32.totalorder %s894_s26, 2  ;;  %s590_s7 = sand.u32 1, %s874_s21  }
 0x18c   : > { %s591_s15 = scalar_lea.sflag [#allocation3], %s590_s7 }
 0x18d   : > { %p762_p2 = pnand %p765_p4, %p981_p8 }
 0x18f   : > { %869 = dma.done.wait (!%p762_p2), %s591_s15, 256  }
 0x190   : > { %871 = vsyncadd (!%p762_p2), %s591_s15, 4294967040  ;;  %s20_s26 = sadd.s32 1, %s894_s26   ;;  %s1093_s21 = smov %s878_s22 }
 0x191   : > { %p17_p3 = scmp.ge.s32.totalorder %s20_s26, 4   ;;  %s1094_s22 = smov %s882_s23 }
 0x192   : > { %s1095_s23 = smov %s987_s10  ;;  %s1096_s24 = smov %s890_s25 }
 0x193   : > { %s1097_s25 = smov %s1099_s29  ;;  %19 = sbr.rel (!%p17_p3) target bundleno = 4 (0x4), region = 106 }
 0x19a   :  { %612 = vsyncpa [#allocation3], 1 }
 0x19b   :  { %614 = vsyncpa [#allocation3 + $0x1], 1 }

</bundles_post_ra>
